<compile_context>
chip_gen: v5e
topology: v5e:2x2
jax: 0.10.0
libtpu: 0.0.40
codegen_flags: <defaults>
</compile_context>

<pallas_src>
import math

import jax
import jax.numpy as jnp
from jax import lax
from jax.experimental import pallas as pl
from jax.experimental.pallas import tpu as pltpu


def _accumulate(x_ref, w_ref, acc_ref):
    # x_ref: (tm, tk), w_ref: (tn, tk)  -- PyTorch nn.Linear weight layout.
    acc_ref[...] += lax.dot_general(
        x_ref[...], w_ref[...],
        dimension_numbers=(((1,), (1,)), ((), ())),   # contract K of both
        preferred_element_type=jnp.float32)


def _res_linear_kernel_fused(x_ref, w_ref, b_ref, o_ref, acc_ref, res_ref):
    """Residual defaults to x: capture the matching x tile (no second HBM read)."""
    j = pl.program_id(1)
    k = pl.program_id(2)

    @pl.when(k == 0)
    def _():
        acc_ref[...] = jnp.zeros_like(acc_ref)

    # The x block at k == j is exactly the residual tile for output block (i, j)
    # (tn == tk and planes == inplanes guaranteed by the wrapper).
    @pl.when(k == j)
    def _():
        res_ref[...] = x_ref[...].astype(jnp.float32)

    _accumulate(x_ref, w_ref, acc_ref)

    @pl.when(k == pl.num_programs(2) - 1)
    def _():
        out = acc_ref[...] + b_ref[...].astype(jnp.float32) + res_ref[...]
        o_ref[...] = jnp.maximum(out, 0.0).astype(o_ref.dtype)


def _res_linear_kernel_explicit(x_ref, w_ref, b_ref, r_ref, o_ref, acc_ref):
    """Explicit residual tensor (residual is not x)."""
    k = pl.program_id(2)

    @pl.when(k == 0)
    def _():
        acc_ref[...] = jnp.zeros_like(acc_ref)

    _accumulate(x_ref, w_ref, acc_ref)

    @pl.when(k == pl.num_programs(2) - 1)
    def _():
        out = (acc_ref[...] + b_ref[...].astype(jnp.float32)
               + r_ref[...].astype(jnp.float32))
        o_ref[...] = jnp.maximum(out, 0.0).astype(o_ref.dtype)


def _pick_tile(dim, target, quantum):
    """Largest tile <= target that divides dim and is a multiple of quantum.

    Falls back to the full dimension (always a legal TPU block shape) for
    small or oddly sized dims.
    """
    if dim <= target:
        return dim
    t = (target // quantum) * quantum
    while t >= quantum:
        if dim % t == 0:
            return t
        t -= quantum
    return dim


def res_linear(x, weight, bias, residual=None, drop_rate=0.0,
               tm_target=256, tn_target=256, tk_target=512):
    """Pallas equivalent of ResLinear.forward (eval semantics).

    x:        [N, inplanes]
    weight:   [planes, inplanes]  (PyTorch nn.Linear layout, NOT pre-transposed)
    bias:     [planes]
    residual: [N, planes] or None (defaults to x; requires planes == inplanes)
    """
    # TODO(synk): drop_rate > 0 (nn.Dropout) is a training-time op; only eval
    # semantics (dropout == identity) are implemented here.
    if drop_rate != 0.0:
        raise NotImplementedError("res_linear: only drop_rate == 0 (eval) supported")

    m, inplanes = x.shape
    planes, k_w = weight.shape
    assert k_w == inplanes, (weight.shape, x.shape)
    assert bias.shape == (planes,), bias.shape

    fused_residual = (residual is None) or (residual is x)
    if fused_residual:
        assert planes == inplanes, (
            "default residual (residual = x) requires planes == inplanes, got "
            f"planes={planes}, inplanes={inplanes}")
    else:
        assert residual.shape == (m, planes), (residual.shape, (m, planes))

    b2d = bias.reshape(1, planes)            # keep 2D for TPU layout

    tm = _pick_tile(m, tm_target, 8)
    tn = _pick_tile(planes, tn_target, 128)
    if fused_residual:
        tk = tn                               # k == j residual capture needs tn == tk
    else:
        tk = _pick_tile(inplanes, tk_target, 128)

    grid = (m // tm, planes // tn, inplanes // tk)

    out_dtype = x.dtype
    bytes_accessed = (m * inplanes * jnp.dtype(x.dtype).itemsize
                      + planes * inplanes * jnp.dtype(weight.dtype).itemsize
                      + planes * jnp.dtype(bias.dtype).itemsize
                      + m * planes * jnp.dtype(out_dtype).itemsize)
    if not fused_residual:
        bytes_accessed += m * planes * jnp.dtype(residual.dtype).itemsize
    cost = pl.CostEstimate(flops=2 * m * inplanes * planes,
                           transcendentals=0,
                           bytes_accessed=bytes_accessed)

    x_spec = pl.BlockSpec((tm, tk), lambda i, j, k: (i, k))
    w_spec = pl.BlockSpec((tn, tk), lambda i, j, k: (j, k))
    b_spec = pl.BlockSpec((1, tn), lambda i, j, k: (0, j))
    o_spec = pl.BlockSpec((tm, tn), lambda i, j, k: (i, j))

    compiler_params = pltpu.CompilerParams(
        dimension_semantics=("parallel", "parallel", "arbitrary"),
        vmem_limit_bytes=32 * 1024 * 1024,    # explicit, safe on v5e/v6e/v7x
    )

    if fused_residual:
        kernel = _res_linear_kernel_fused
        in_specs = [x_spec, w_spec, b_spec]
        scratch = [pltpu.VMEM((tm, tn), jnp.float32),   # f32 accumulator
                   pltpu.VMEM((tm, tn), jnp.float32)]   # captured residual tile
        operands = (x, weight, b2d)
    else:
        kernel = _res_linear_kernel_explicit
        in_specs = [x_spec, w_spec, b_spec,
                    pl.BlockSpec((tm, tn), lambda i, j, k: (i, j))]
        scratch = [pltpu.VMEM((tm, tn), jnp.float32)]   # f32 accumulator
        operands = (x, weight, b2d, residual)

    return pl.pallas_call(
        kernel,
        out_shape=jax.ShapeDtypeStruct((m, planes), out_dtype),
        grid_spec=pltpu.PrefetchScalarGridSpec(
            num_scalar_prefetch=0,
            grid=grid,
            in_specs=in_specs,
            out_specs=o_spec,
            scratch_shapes=scratch),
        compiler_params=compiler_params,
        cost_estimate=cost,
    )(*operands)


def _init_linear_params(key, inplanes, planes, dtype=jnp.float32):
    # Deterministic init mimicking nn.Linear default (uniform +/- 1/sqrt(fan_in)).
    kw, kb = jax.random.split(key)
    bound = 1.0 / math.sqrt(inplanes)
    weight = jax.random.uniform(kw, (planes, inplanes), dtype, -bound, bound)
    bias = jax.random.uniform(kb, (planes,), dtype, -bound, bound)
    return weight, bias


if __name__ == "__main__":
    key = jax.random.PRNGKey(0)
    k1, k2, k3, k4, k5 = jax.random.split(key, 5)

    # Case 1: default residual (residual = x), multi-block (2, 2, 2) grid.
    m, features = 128, 256
    x = jax.random.normal(k1, (m, features), jnp.float32)
    w, b = _init_linear_params(k2, features, features)
    out = res_linear(x, w, b, tm_target=64, tn_target=128, tk_target=128)
    out = jax.block_until_ready(out)
    ref = jnp.maximum(x @ w.T + b + x, 0.0)
    assert out.shape == ref.shape
    assert jnp.allclose(out, ref, atol=2e-2, rtol=2e-2), \
        float(jnp.max(jnp.abs(out - ref)))

    # Case 2: explicit residual, planes != inplanes, grid (1, 3, 2).
    m2, inpl, pln = 64, 256, 384
    x2 = jax.random.normal(k3, (m2, inpl), jnp.float32)
    w2, b2 = _init_linear_params(k4, inpl, pln)
    r2 = jax.random.normal(k5, (m2, pln), jnp.float32)
    out2 = res_linear(x2, w2, b2, residual=r2,
                      tm_target=64, tn_target=128, tk_target=128)
    out2 = jax.block_until_ready(out2)
    ref2 = jnp.maximum(x2 @ w2.T + b2 + r2, 0.0)
    assert jnp.allclose(out2, ref2, atol=2e-2, rtol=2e-2), \
        float(jnp.max(jnp.abs(out2 - ref2)))

    # Case 3: tiny shapes (blocks fall back to full dims, grid = (1, 1, 1)).
    m3, feat3 = 8, 32
    x3 = jax.random.normal(k1, (m3, feat3), jnp.float32)
    w3, b3 = _init_linear_params(k2, feat3, feat3)
    out3 = jax.block_until_ready(res_linear(x3, w3, b3))
    ref3 = jnp.maximum(x3 @ w3.T + b3 + x3, 0.0)
    assert jnp.allclose(out3, ref3, atol=2e-2, rtol=2e-2), \
        float(jnp.max(jnp.abs(out3 - ref3)))

    print("KERNEL_OK")
</pallas_src>

<mosaic_0001>
module attributes {stable_mosaic.version = 11 : i64} {
  func.func @_res_linear_kernel_fused(%arg0: i32, %arg1: i32, %arg2: i32, %arg3: memref<64x128xf32, #tpu.memory_space<vmem>>, %arg4: memref<128x128xf32, #tpu.memory_space<vmem>>, %arg5: memref<1x128xf32, #tpu.memory_space<vmem>>, %arg6: memref<64x128xf32, #tpu.memory_space<vmem>>, %arg7: memref<64x128xf32, #tpu.memory_space<vmem>>, %arg8: memref<64x128xf32, #tpu.memory_space<vmem>>) attributes {dimension_semantics = [#tpu.dimension_semantics<parallel>, #tpu.dimension_semantics<parallel>, #tpu.dimension_semantics<arbitrary>], iteration_bounds = array<i64: 2, 2, 2>, scalar_prefetch = 0 : i64, scratch_operands = 2 : i64, tpu.core_type = #tpu.core_type<tc>, window_params = [{transform_indices = @transform_0, window_bounds = array<i64: 64, 128>}, {transform_indices = @transform_1, window_bounds = array<i64: 128, 128>}, {transform_indices = @transform_2, window_bounds = array<i64: 1, 128>}, {transform_indices = @transform_3, window_bounds = array<i64: 64, 128>}]} {
    %c0_i32 = arith.constant 0 : i32
    %0 = arith.cmpi eq, %arg2, %c0_i32 : i32
    %1 = arith.extui %0 : i1 to i32
    %c0_i32_0 = arith.constant 0 : i32
    %2 = arith.cmpi ne, %1, %c0_i32_0 : i32
    scf.if %2 {
      %cst_10 = arith.constant 0.000000e+00 : f32
      %15 = vector.broadcast %cst_10 : f32 to vector<64x128xf32>
      %c0_11 = arith.constant 0 : index
      %c0_12 = arith.constant 0 : index
      %16 = vector.load %arg7[%c0_11, %c0_12] : memref<64x128xf32, #tpu.memory_space<vmem>>, vector<64x128xf32>
      tpu.vector_store %arg7[%c0_11, %c0_12], %15 {strides = array<i32>} : memref<64x128xf32, #tpu.memory_space<vmem>>, vector<64x128xf32>,
    } else {
    }
    %3 = arith.cmpi eq, %arg2, %arg1 : i32
    %4 = arith.extui %3 : i1 to i32
    %c0_i32_1 = arith.constant 0 : i32
    %5 = arith.cmpi ne, %4, %c0_i32_1 : i32
    scf.if %5 {
      %c0_10 = arith.constant 0 : index
      %c0_11 = arith.constant 0 : index
      %15 = vector.load %arg3[%c0_10, %c0_11] : memref<64x128xf32, #tpu.memory_space<vmem>>, vector<64x128xf32>
      %c0_12 = arith.constant 0 : index
      %c0_13 = arith.constant 0 : index
      %16 = vector.load %arg8[%c0_12, %c0_13] : memref<64x128xf32, #tpu.memory_space<vmem>>, vector<64x128xf32>
      tpu.vector_store %arg8[%c0_12, %c0_13], %15 {strides = array<i32>} : memref<64x128xf32, #tpu.memory_space<vmem>>, vector<64x128xf32>,
    } else {
    }
    %c0 = arith.constant 0 : index
    %c0_2 = arith.constant 0 : index
    %6 = vector.load %arg7[%c0, %c0_2] : memref<64x128xf32, #tpu.memory_space<vmem>>, vector<64x128xf32>
    %c0_3 = arith.constant 0 : index
    %c0_4 = arith.constant 0 : index
    %7 = vector.load %arg3[%c0_3, %c0_4] : memref<64x128xf32, #tpu.memory_space<vmem>>, vector<64x128xf32>
    %c0_5 = arith.constant 0 : index
    %c0_6 = arith.constant 0 : index
    %8 = vector.load %arg4[%c0_5, %c0_6] : memref<128x128xf32, #tpu.memory_space<vmem>>, vector<128x128xf32>
    %cst = arith.constant dense<0.000000e+00> : vector<64x128xf32>
    %9 = tpu.matmul %7, %8, %cst {dimension_numbers = #tpu.dot_dimension_numbers<[1], [1], [0], [0], [0, 0, 1, 0], [], []>} : vector<64x128xf32>, vector<128x128xf32>, vector<64x128xf32> -> vector<64x128xf32>
    %10 = arith.addf %6, %9 : vector<64x128xf32>
    %c0_7 = arith.constant 0 : index
    %c0_8 = arith.constant 0 : index
    %11 = vector.load %arg7[%c0_7, %c0_8] : memref<64x128xf32, #tpu.memory_space<vmem>>, vector<64x128xf32>
    tpu.vector_store %arg7[%c0_7, %c0_8], %10 {strides = array<i32>} : memref<64x128xf32, #tpu.memory_space<vmem>>, vector<64x128xf32>,
    %c1_i32 = arith.constant 1 : i32
    %12 = arith.cmpi eq, %arg2, %c1_i32 : i32
    %13 = arith.extui %12 : i1 to i32
    %c0_i32_9 = arith.constant 0 : i32
    %14 = arith.cmpi ne, %13, %c0_i32_9 : i32
    scf.if %14 {
      %c0_10 = arith.constant 0 : index
      %c0_11 = arith.constant 0 : index
      %15 = vector.load %arg7[%c0_10, %c0_11] : memref<64x128xf32, #tpu.memory_space<vmem>>, vector<64x128xf32>
      %c0_12 = arith.constant 0 : index
      %c0_13 = arith.constant 0 : index
      %16 = vector.load %arg5[%c0_12, %c0_13] : memref<1x128xf32, #tpu.memory_space<vmem>>, vector<1x128xf32>
      %17 = vector.broadcast %16 : vector<1x128xf32> to vector<64x128xf32>
      %18 = arith.addf %15, %17 : vector<64x128xf32>
      %c0_14 = arith.constant 0 : index
      %c0_15 = arith.constant 0 : index
      %19 = vector.load %arg8[%c0_14, %c0_15] : memref<64x128xf32, #tpu.memory_space<vmem>>, vector<64x128xf32>
      %20 = arith.addf %18, %19 : vector<64x128xf32>
      %cst_16 = arith.constant 0.000000e+00 : f32
      %21 = vector.broadcast %cst_16 : f32 to vector<64x128xf32>
      %22 = arith.maximumf %20, %21 : vector<64x128xf32>
      %c0_17 = arith.constant 0 : index
      %c0_18 = arith.constant 0 : index
      %23 = vector.load %arg6[%c0_17, %c0_18] : memref<64x128xf32, #tpu.memory_space<vmem>>, vector<64x128xf32>
      tpu.vector_store %arg6[%c0_17, %c0_18], %22 {strides = array<i32>} : memref<64x128xf32, #tpu.memory_space<vmem>>, vector<64x128xf32>,
    } else {
    }
    return
  }
  func.func @transform_0(%arg0: i32, %arg1: i32, %arg2: i32) -> (i32, i32) {
    %c0_i32 = arith.constant 0 : i32
    return %arg0, %arg2 : i32, i32
  }
  func.func @transform_1(%arg0: i32, %arg1: i32, %arg2: i32) -> (i32, i32) {
    %c0_i32 = arith.constant 0 : i32
    return %arg1, %arg2 : i32, i32
  }
  func.func @transform_2(%arg0: i32, %arg1: i32, %arg2: i32) -> (i32, i32) {
    %c0_i32 = arith.constant 0 : i32
    %c0_i32_0 = arith.constant 0 : i32
    return %c0_i32, %arg1 : i32, i32
  }
  func.func @transform_3(%arg0: i32, %arg1: i32, %arg2: i32) -> (i32, i32) {
    %c0_i32 = arith.constant 0 : i32
    return %arg0, %arg1 : i32, i32
  }
}

</mosaic_0001>

<bundles_post_ra>
// kernel: tpu_custom_call.1
= control target key start
LH: loop header
LB: loop body
LE: loop exit
PB: predicated region body
PF: predicated region fallthrough
CT: control target
= control target key end

     0   :  { %s1618_s0 = inlined_call_operand.hbm [shape: f32[128,256], index: 0, kind: input, shape index: {}]   ;;  %s1619_s1 = inlined_call_operand.hbm [shape: f32[256,256], index: 1, kind: input, shape index: {}]   ;;  %s1620_s2 = inlined_call_operand.hbm [shape: f32[1,256], index: 2, kind: input, shape index: {}]   ;;  %s1621_s3 = inlined_call_operand.hbm [shape: f32[128,256], index: 3, kind: output, shape index: {}]  }
   0x1   :  { %1636 = sst [smem:[#allocation30_spill]] %s1618_s0 }
   0x2   :  { %1637 = sst [smem:[#allocation31_spill]] %s1619_s1 }
   0x3   :  { %1638 = sst [smem:[#allocation32_spill]] %s1620_s2 }
   0x4   :  { %1639 = sst [smem:[#allocation33_spill]] %s1621_s3 }
   0x5   :  { %8 = vsyncpa [#allocation5], 0 }
   0x6   :  { %10 = vsyncpa [#allocation5 + $0x1], 0 }
   0x7   :  { %11 = vsyncpa [#allocation8], 0 }
   0x8   :  { %13 = vsyncpa [#allocation8 + $0x1], 0 }
   0x9   :  { %14 = vsyncpa [#allocation6], 0 }
   0xa   :  { %16 = vsyncpa [#allocation6 + $0x1], 0  ;;  %s1200_s12 = smov 0   ;;  %s1202_s13 = smov 0  }
   0xb   :  { %s1204_s14 = smov 0   ;;  %s1206_s15 = smov 0  }
   0xc   :  { %s1208_s16 = smov 0   ;;  %s1210_s17 = smov 0  }
   0xd   :  { %s1212_s18 = smov 0   ;;  %s1214_s19 = smov 0  }
   0xe   :  { %s1216_s20 = smov 0   ;;  %s1218_s21 = smov 0  }
   0xf   :  { %s1220_s22 = smov 0   ;;  %s1222_s23 = smov 0  }
  0x10   :  { %s1224_s24 = smov 0   ;;  %s1226_s25 = smov 0  }
  0x11   :  { %s1228_s26 = smov 0   ;;  %s1230_s27 = smov 0  }
  0x12   :  { %s1232_s28 = smov 0   ;;  %s1234_s29 = smov 0  }
  0x13   :  { %s1236_s30 = smov 0  }
  0x14 LB: > { %1640 = sst [smem:[#allocation15_spill]] %s1099_s12  ;;  %s34_s4 = sadd.s32 1, %s1159_s27  ;;  %s1171_s30 = sphi %s1236_s30, %s22_s30   ;;  %s1167_s29 = sphi %s1234_s29, %s1711_s29   ;;  %s1163_s28 = sphi %s1232_s28, %s1710_s28   ;;  %s1159_s27 = sphi %s1230_s27, %s1694_s27   ;;  %s1155_s26 = sphi %s1228_s26, %s1693_s26   ;;  %s1151_s25 = sphi %s1226_s25, %s1709_s25   ;;  %s1147_s24 = sphi %s1224_s24, %s1708_s24   ;;  %s1143_s23 = sphi %s1222_s23, %s1707_s23   ;;  %s1139_s22 = sphi %s1220_s22, %s1706_s22   ;;  %s1135_s21 = sphi %s1218_s21, %s1705_s21   ;;  %s1131_s20 = sphi %s1216_s20, %s1704_s20   ;;  %s1127_s19 = sphi %s1214_s19, %s1703_s19   ;;  %s1123_s18 = sphi %s1212_s18, %s1702_s18   ;;  %s1119_s17 = sphi %s1210_s17, %s1701_s17   ;;  %s1115_s16 = sphi %s1208_s16, %s1700_s16   ;;  %s1111_s15 = sphi %s1206_s15, %s1699_s15   ;;  %s1107_s14 = sphi %s1204_s14, %s1698_s14   ;;  %s1103_s13 = sphi %s1202_s13, %s1696_s13   ;;  %s1099_s12 = sphi %s1200_s12, %s1688_s12  }
  0x15   : > { %1641 = sst [smem:[#allocation16_spill]] %s1103_s13  ;;  %s37_s5 = sadd.s32 1, %s1163_s28 }
  0x16   : > { %1642 = sst [smem:[#allocation17_spill]] %s1111_s15  ;;  %p35_p0 = scmp.ge.s32.totalorder %s34_s4, 2 }
  0x17   : > { %1643 = sst [smem:[#allocation18_spill]] %s1123_s18  ;;  %p58_p1 = scmp.eq.s32.totalorder %s1171_s30, 0 }
  0x18   : > { %1644 = sst [smem:[#allocation19_spill]] %s1143_s23  ;;  %s78_s6 = sadd.s32 1, %s1131_s20 }
  0x19   : > { %1645 = sst [smem:[#allocation20_spill]] %s1147_s24  ;;  %p85_p2 = scmp.ne.s32.totalorder %s1131_s20, %s1127_s19 }
  0x1a   : > { %1646 = sst [smem:[#allocation21_spill]] %s1151_s25  ;;  %s1713_s4 = smov (%p35_p0, %s34_s4), 0 }
  0x1b   : > { %1647 = sst [smem:[#allocation22_spill]] %s1155_s26  ;;  %s1715_s5 = smov (!%p35_p0, %s37_s5), %s1163_s28 }
  0x1c   : > { %1648 = sst [smem:[#allocation23_spill]] %s1159_s27  ;;  %s1308_s7 = ssub.s32 %s1159_s27, %s1713_s4 }
  0x1d   : > { %1649 = sst [smem:[#allocation24_spill]] %s1167_s29  ;;  %p1312_p3 = por %p85_p2, %p58_p1 }
  0x1e   : > { %1650 = sst [smem:[#allocation25_spill]] %s1713_s4  ;;  %p39_p4 = scmp.ge.s32.totalorder %s1715_s5, 2 }
  0x1f   : > { %p91_p5 = scmp.ne.s32.totalorder %s1127_s19, %s1123_s18  ;;  %p1635_p6 = scmp.lt.s32.totalorder %s1171_s30, 8 }
  0x20   : > { %s1323_s9 = scalar_select %p39_p4, 0, %s1715_s5  }
  0x21   : > { %s193_s4 = sand.u32 1, %s1171_s30   ;;  %s195_s3 = sand.u32 1, %s1131_s20  }
  0x22   : > { %1652 = sst [smem:[#allocation26_spill]] %s1323_s9  ;;  %s1327_s10 = ssub.s32 %s1163_s28, %s1323_s9 }
  0x23   : > { %s75_s11 = sor.u32 %s1327_s10, %s1308_s7  ;;  %s653_s26 = sshll.u32 %s1163_s28, 5 }
  0x24   : > { %p76_p7 = scmp.eq.s32.totalorder %s75_s11, 0  ;;  %s635_s24 = sshll.u32 %s195_s3, 7 }
  0x25   : > { %s202_s2 = sadd.s32 %s1159_s27, %s653_s26  ;;  %s1654_s1 = sld [smem:[#allocation31_spill]] }
  0x26   : > { %s1335_s25 = scalar_select %p76_p7, %s1131_s20, %s78_s6  }
  0x27   : > { %s638_s12 = sshll.u32 %s202_s2, 3  ;;  %s197_s0 = scalar_lea.vmem [#allocation7], %s635_s24 }
  0x28   : > { %1653 = sst [smem:[#allocation27_spill]] %s1335_s25  ;;  %s207_s18 = sshll.u32 %s197_s0, 4  ;;  %s208_s18 = int_to_ptr.vmem [resolvable:$true] %s207_s18 }
  0x29   : > { %p715_p8 = pnand %p1635_p6, %p1312_p3  ;;  %p639_p9 = scmp.ge.s32.totalorder %s1171_s30, 1 }
  0x2a   : > { %p232_p10 = scmp.lt.s32.totalorder %s1171_s30, 9  ;;  %s1347_s2 = scalar_lea.sflag [#allocation8], %s193_s4 }
  0x2b   : > { %s204_s9 = scalar_lea.hbm %s1654_s1, %s638_s12  ;;  %s1628_s3 = smov 256  }
  0x2c   : > { %s205_s11 = sshll.u32 %s204_s9, 4  ;;  %s1629_s0 = smov 128   ;;  %s206_s11 = int_to_ptr.hbm [resolvable:$true] %s205_s11 }
  0x2d   : > { %s1630_s12 = smov 8   ;;  %p1353_p11 = pnand %p639_p9, %p232_p10 }
  0x2e   : > { %717 = dma.hbm_to_vmem [thread:$0]  (!%p715_p8), %s206_s11, 2048, %s208_s18, %s1347_s2, %s1628_s3, %s1629_s0, %s1630_s12  }
  0x2f   : > { %s41_s15 = sadd.s32 1, %s1167_s29  ;;  %s50_s24 = sadd.s32 1, %s1143_s23 }
  0x30   : > { %s1717_s15 = smov (!%p39_p4, %s41_s15), %s1167_s29  ;;  %p57_p12 = scmp.ne.s32.totalorder %s1143_s23, %s1139_s22 }
  0x31   : > { %p63_p13 = scmp.ne.s32.totalorder %s1139_s22, %s1135_s21  ;;  %p43_p0 = scmp.ge.s32.totalorder %s1717_s15, 2 }
  0x32   : > { %s132_s26 = sadd.s32 1, %s1107_s14  ;;  %p1369_p2 = por %p58_p1, %p57_p12 }
  0x33   : > { %s169_s18 = sand.u32 1, %s1143_s23   ;;  %s1719_s15 = smov (%p43_p0, %s1717_s15), 0 }
  0x34   : > { %1657 = sst [smem:[#allocation28_spill]] %s1719_s15  ;;  %s631_s5 = sshll.u32 %s169_s18, 6 }
  0x35   : > { %s45_s6 = ssub.s32 %s1167_s29, %s1719_s15  ;;  %s652_s11 = sshll.u32 %s1167_s29, 4 }
  0x36   : > { %s47_s8 = sor.u32 %s1308_s7, %s45_s6  ;;  %s129_s9 = sor.u32 %s1327_s10, %s45_s6 }
  0x37   : > { %p48_p3 = scmp.eq.s32.totalorder %s47_s8, 0  ;;  %p130_p4 = scmp.eq.s32.totalorder %s129_s9, 0 }
  0x38   : > { %s173_s3 = scalar_lea.vmem [#allocation4], %s631_s5  ;;  %s178_s15 = sadd.s32 %s1159_s27, %s652_s11 }
  0x39   : > { %s183_s0 = sshll.u32 %s173_s3, 4  ;;  %s634_s6 = sshll.u32 %s178_s15, 3  ;;  %s184_s0 = int_to_ptr.vmem [resolvable:$true] %s183_s0 }
  0x3a   : > { %s1382_s12 = scalar_select %p48_p3, %s1143_s23, %s50_s24  }
  0x3b   : > { %s1385_s1 = scalar_select %p130_p4, %s1107_s14, %s132_s26  }
  0x3c   : > { %1658 = sst [smem:[#allocation29_spill]] %s1382_s12  ;;  %p712_p7 = pnand %p1635_p6, %p1369_p2 }
  0x3d   : > { %s1660_s24 = sld [smem:[#allocation30_spill]]  ;;  %s170_s11 = scalar_lea.sflag [#allocation5], %s169_s18 }
  0x3e   : > { %s1661_s8 = sld [smem:[#allocation17_spill]]  ;;  %s1663_s27 = smov 8  }
  0x3f   : > { %s1662_s26 = sld [smem:[#allocation16_spill]]  ;;  %s1664_s12 = smov 128  }
  0x40   : > { %s1665_s23 = smov 256   ;;  %s1666_s25 = sld [smem:[#allocation15_spill]] }
  0x41   : > { %s1399_s15 = sadd.s32 4294967295, %s1171_s30   ;;  %s628_s4 = sadd.s32 4294967294, %s1171_s30  }
  0x42   : > { %p64_p8 = scmp.eq.s32.totalorder %s1399_s15, 0  ;;  %p102_p9 = scmp.eq.s32.totalorder %s1327_s10, 0 }
  0x43   : > { %s180_s9 = scalar_lea.hbm %s1660_s24, %s634_s6  ;;  %s104_s6 = sadd.s32 1, %s1119_s17 }
  0x44   : > { %s181_s29 = sshll.u32 %s180_s9, 4  ;;  %p111_p10 = scmp.ne.s32.totalorder %s1119_s17, %s1115_s16  ;;  %s182_s29 = int_to_ptr.hbm [resolvable:$true] %s181_s29 }
  0x45   : > { %714 = dma.hbm_to_vmem [thread:$0]  (!%p712_p7), %s182_s29, 1024, %s184_s0, %s170_s11, %s1665_s23, %s1664_s12, %s1663_s27  }
  0x46   : > { %p1410_p12 = por %p64_p8, %p63_p13  ;;  %p1417_p0 = por %p91_p5, %p64_p8 }
  0x47   : > { %s1422_s23 = scalar_select %p102_p9, %s1119_s17, %s104_s6  }
  0x48   : > { %p1426_p2 = por %p111_p10, %p58_p1  ;;  %p117_p3 = scmp.ne.s32.totalorder %s1115_s16, %s1661_s8 }
  0x49   : > { %p142_p13 = scmp.ne.s32.totalorder %s1107_s14, %s1662_s26  ;;  %p143_p4 = scmp.eq.s32.totalorder %s1399_s15, 7 }
  0x4a   : > { %p1435_p7 = por %p117_p3, %p64_p8  ;;  %p148_p5 = scmp.ne.s32.totalorder %s1662_s26, %s1666_s25 }
  0x4b   : > { %p1441_p6 = por %p143_p4, %p142_p13  ;;  %p149_p9 = scmp.eq.s32.totalorder %s628_s4, 7 }
  0x4c   : > { %s219_s10 = sand.u32 1, %s1119_s17   ;;  %s1672_s7 = sld [smem:[#allocation32_spill]] }
  0x4d   : > { %p1450_p1 = por %p149_p9, %p148_p5  ;;  %s220_s9 = scalar_lea.vmem [#allocation9], %s219_s10 }
  0x4e   : > { %s227_s11 = sshll.u32 %s220_s9, 4  ;;  %p1674_p8 = scmp.lt.s32.totalorder %s1171_s30, 8  ;;  %s228_s11 = int_to_ptr.vmem [resolvable:$true] %s227_s11 }
  0x4f   : > { %s238_s25 = sand.u32 (!%p1353_p11), 1, %s1139_s22  }
  0x50   : > { %p718_p10 = pnand %p1674_p8, %p1426_p2  ;;  %236 = sbr.rel (%p1353_p11) target bundleno = 387 (0x183), region = 32 }
  0x51   : > { %s640_s26 = sshll.u32 (!%p1353_p11), %s238_s25, 6  ;;  %s239_s4 = scalar_lea.sflag (!%p1353_p11), [#allocation5], %s238_s25 }
  0x52   : > { %s223_s5 = scalar_lea.hbm %s1672_s7, %s1163_s28  ;;  %s1462_s6 = scalar_lea.vmem (!%p1353_p11), [#allocation4], %s640_s26 }
  0x53   : > { %s225_s8 = sshll.u32 %s223_s5, 4  ;;  %s226_s8 = int_to_ptr.hbm [resolvable:$true] %s225_s8 }
  0x54   : > { %720 = dma.hbm_to_vmem [thread:$0]  (!%p718_p10), %s226_s8, 16, %s228_s11, %s1347_s2  }
  0x55   : > { %1082 = dma.done.wait (%p1410_p12), %s239_s4, 1024  }
  0x56   : > { %1084 = vsyncadd (%p1410_p12), %s239_s4, 4294966272  ;;  %s248_s27 = sand.u32 1, %s1399_s15   ;;  %s250_s2 = sand.u32 1, %s1127_s19  }
  0x57   : > { %s641_s10 = sshll.u32 %s250_s2, 7  ;;  %s249_s13 = scalar_lea.sflag [#allocation8], %s248_s27 }
  0x58   : > { %s1470_s0 = scalar_lea.vmem [#allocation7], %s641_s10 }
  0x59   : > { %1086 = dma.done.wait (%p1417_p0), %s249_s13, 2048  }
  0x5a   : > { %1088 = vsyncadd (%p1417_p0), %s249_s13, 4294965248  ;;  %s260_s12 = sand.u32 1, %s1115_s16  }
  0x5b   : > { %s1477_s7 = scalar_lea.vmem [#allocation9], %s260_s12 }
  0x5c   : > { %1090 = dma.done.wait (%p1435_p7), %s249_s13, 16  }
  0x5d   : > { %1092 = vsyncadd (%p1435_p7), %s249_s13, 4294967280  ;;  %s1675_s15 = sld [smem:[#allocation16_spill]] }
  0x5e   : > { %s1676_s9 = sld [smem:[#allocation20_spill]] }
  0x63   : > { %s291_s18 = sand.u32 1, %s1675_s15  }
  0x64   : > { %s642_s5 = sshll.u32 %s291_s18, 6  ;;  %p643_p11 = scmp.ne.s32.totalorder %s1676_s9, 0 }
  0x65   : > { %s1486_s8 = scalar_lea.vmem [#allocation10], %s642_s5 }
  0x66   : > { %300 = sbr.rel (%p643_p11) target bundleno = 116 (0x74), region = 48 }
  0x6b   : > { %v1176_v0 = vmov 0.0  }
  0x6c   : > { %301 = vst [vmem:[#allocation2 + $0x30] sm:$0xff] %v1176_v0 }
  0x6d   : > { %302 = vst [vmem:[#allocation2] sm:$0xff] %v1176_v0 }
  0x6e   : > { %303 = vst [vmem:[#allocation2 + $0x18] sm:$0xff] %v1176_v0 }
  0x6f   : > { %304 = vst [vmem:[#allocation2 + $0x10] sm:$0xff] %v1176_v0 }
  0x70   : > { %305 = vst [vmem:[#allocation2 + $0x8] sm:$0xff] %v1176_v0 }
  0x71   : > { %306 = vst [vmem:[#allocation2 + $0x20] sm:$0xff] %v1176_v0 }
  0x72   : > { %307 = vst [vmem:[#allocation2 + $0x28] sm:$0xff] %v1176_v0 }
  0x73   : > { %308 = vst [vmem:[#allocation2 + $0x38] sm:$0xff] %v1176_v0 }
  0x74 PF: > { %s1677_s3 = sld [smem:[#allocation21_spill]] }
  0x75   : > { %s1678_s21 = sld [smem:[#allocation20_spill]] }
  0x7b   : > { %p644_p12 = scmp.ne.s32.totalorder %s1678_s21, %s1677_s3 }
  0x7d   : > { %312 = sbr.rel (%p644_p12) target bundleno = 139 (0x8b), region = 52 }
  0x82   : > { %v313_v1 = vld [vmem:[%s1462_s6] sm:$0xff]  ;;  %v314_v2 = vld [vmem:[%s1462_s6 + $0x8] sm:$0xff]  ;;  %v315_v3 = vld [vmem:[%s1462_s6 + $0x10] sm:$0xff] }
  0x83   : > { %321 = vst [vmem:[#allocation3] sm:$0xff] %v313_v1  ;;  %v316_v4 = vld [vmem:[%s1462_s6 + $0x18] sm:$0xff]  ;;  %v317_v5 = vld [vmem:[%s1462_s6 + $0x20] sm:$0xff]  ;;  %v318_v6 = vld [vmem:[%s1462_s6 + $0x28] sm:$0xff] }
  0x84   : > { %322 = vst [vmem:[#allocation3 + $0x18] sm:$0xff] %v314_v2  ;;  %v319_v7 = vld [vmem:[%s1462_s6 + $0x30] sm:$0xff]  ;;  %v320_v8 = vld [vmem:[%s1462_s6 + $0x38] sm:$0xff] }
  0x85   : > { %323 = vst [vmem:[#allocation3 + $0x10] sm:$0xff] %v315_v3 }
  0x86   : > { %324 = vst [vmem:[#allocation3 + $0x20] sm:$0xff] %v316_v4 }
  0x87   : > { %325 = vst [vmem:[#allocation3 + $0x28] sm:$0xff] %v317_v5 }
  0x88   : > { %326 = vst [vmem:[#allocation3 + $0x8] sm:$0xff] %v318_v6 }
  0x89   : > { %327 = vst [vmem:[#allocation3 + $0x30] sm:$0xff] %v319_v7 }
  0x8a   : > { %328 = vst [vmem:[#allocation3 + $0x38] sm:$0xff] %v320_v8 }
  0x8b PF: > { %v360_v9 = vld [vmem:[%s1470_s0 + $0x78] sm:$0xff]  ;;  %v359_v10 = vld [vmem:[%s1470_s0 + $0x70] sm:$0xff]  ;;  %v358_v11 = vld [vmem:[%s1470_s0 + $0x68] sm:$0xff]  ;;  %s1679_s11 = sld [smem:[#allocation20_spill]] }
  0x8c   : > { %656 = vmatpush.xpose.msra.mxu2 %v360_v9  ;;  %657 = vmatpush.xpose.msra.mxu3 %v360_v9  ;;  %v357_v12 = vld [vmem:[%s1470_s0 + $0x60] sm:$0xff]  ;;  %v356_v13 = vld [vmem:[%s1470_s0 + $0x58] sm:$0xff]  ;;  %v355_v14 = vld [vmem:[%s1470_s0 + $0x50] sm:$0xff] }
  0x8d   : > { %361 = vmatpush.xpose.msra.mxu0 %v360_v9  ;;  %655 = vmatpush.xpose.msra.mxu1 %v360_v9  ;;  %v354_v15 = vld [vmem:[%s1470_s0 + $0x48] sm:$0xff]  ;;  %v353_v16 = vld [vmem:[%s1470_s0 + $0x40] sm:$0xff]  ;;  %v352_v17 = vld [vmem:[%s1470_s0 + $0x38] sm:$0xff] }
  0x8e   : > { %v351_v18 = vld [vmem:[%s1470_s0 + $0x30] sm:$0xff]  ;;  %v350_v19 = vld [vmem:[%s1470_s0 + $0x28] sm:$0xff]  ;;  %v349_v20 = vld [vmem:[%s1470_s0 + $0x20] sm:$0xff] }
  0x8f   : > { %v348_v21 = vld [vmem:[%s1470_s0 + $0x18] sm:$0xff]  ;;  %v347_v22 = vld [vmem:[%s1470_s0 + $0x10] sm:$0xff]  ;;  %v346_v23 = vld [vmem:[%s1470_s0 + $0x8] sm:$0xff] }
  0x90   : > { %659 = vmatpush.xpose.msra.mxu2 %v359_v10  ;;  %660 = vmatpush.xpose.msra.mxu3 %v359_v10  ;;  %v345_v24 = vld [vmem:[%s1470_s0] sm:$0xff]  ;;  %v343_v26 = vld [vmem:[%s1462_s6 + $0x30] sm:$0xff]  ;;  %v342_v29 = vld [vmem:[%s1462_s6 + $0x28] sm:$0xff] }
  0x91   : > { %362 = vmatpush.xpose.msra.mxu0 %v359_v10  ;;  %658 = vmatpush.xpose.msra.mxu1 %v359_v10  ;;  %v341_v25 = vld [vmem:[%s1462_s6 + $0x20] sm:$0xff]  ;;  %v339_v28 = vld [vmem:[%s1462_s6 + $0x10] sm:$0xff]  ;;  %v344_v30 = vld [vmem:[%s1462_s6 + $0x38] sm:$0xff]  ;;  %p645_p0 = scmp.ne.s32.totalorder %s1679_s11, 1 }
  0x92   : > { %v337_v27 = vld [vmem:[%s1462_s6] sm:$0xff]  ;;  %v338_v31 = vld [vmem:[%s1462_s6 + $0x8] sm:$0xff]  ;;  %v340_v32 = vld [vmem:[%s1462_s6 + $0x18] sm:$0xff] }
  0x93   : > { %v329_v33 = vld [vmem:[#allocation2 + $0x30] sm:$0xff]  ;;  %v331_v34 = vld [vmem:[#allocation2 + $0x18] sm:$0xff]  ;;  %v333_v39 = vld [vmem:[#allocation2 + $0x8] sm:$0xff] }
  0x94   : > { %662 = vmatpush.xpose.msra.mxu2 %v358_v11  ;;  %663 = vmatpush.xpose.msra.mxu3 %v358_v11  ;;  %v335_v40 = vld [vmem:[#allocation2 + $0x28] sm:$0xff]  ;;  %v330_v45 = vld [vmem:[#allocation2] sm:$0xff]  ;;  %v332_v46 = vld [vmem:[#allocation2 + $0x10] sm:$0xff] }
  0x95   : > { %363 = vmatpush.xpose.msra.mxu0 %v358_v11  ;;  %661 = vmatpush.xpose.msra.mxu1 %v358_v11  ;;  %v334_v51 = vld [vmem:[#allocation2 + $0x20] sm:$0xff]  ;;  %v336_v52 = vld [vmem:[#allocation2 + $0x38] sm:$0xff] }
  0x98   : > { %665 = vmatpush.xpose.msra.mxu2 %v357_v12  ;;  %666 = vmatpush.xpose.msra.mxu3 %v357_v12 }
  0x99   : > { %364 = vmatpush.xpose.msra.mxu0 %v357_v12  ;;  %664 = vmatpush.xpose.msra.mxu1 %v357_v12 }
  0x9c   : > { %668 = vmatpush.xpose.msra.mxu2 %v356_v13  ;;  %669 = vmatpush.xpose.msra.mxu3 %v356_v13 }
  0x9d   : > { %365 = vmatpush.xpose.msra.mxu0 %v356_v13  ;;  %667 = vmatpush.xpose.msra.mxu1 %v356_v13 }
  0xa0   : > { %671 = vmatpush.xpose.msra.mxu2 %v355_v14  ;;  %672 = vmatpush.xpose.msra.mxu3 %v355_v14 }
  0xa1   : > { %366 = vmatpush.xpose.msra.mxu0 %v355_v14  ;;  %670 = vmatpush.xpose.msra.mxu1 %v355_v14 }
  0xa4   : > { %674 = vmatpush.xpose.msra.mxu2 %v354_v15  ;;  %675 = vmatpush.xpose.msra.mxu3 %v354_v15 }
  0xa5   : > { %367 = vmatpush.xpose.msra.mxu0 %v354_v15  ;;  %673 = vmatpush.xpose.msra.mxu1 %v354_v15 }
  0xa8   : > { %677 = vmatpush.xpose.msra.mxu2 %v353_v16  ;;  %678 = vmatpush.xpose.msra.mxu3 %v353_v16 }
  0xa9   : > { %368 = vmatpush.xpose.msra.mxu0 %v353_v16  ;;  %676 = vmatpush.xpose.msra.mxu1 %v353_v16 }
  0xac   : > { %680 = vmatpush.xpose.msra.mxu2 %v352_v17  ;;  %681 = vmatpush.xpose.msra.mxu3 %v352_v17 }
  0xad   : > { %369 = vmatpush.xpose.msra.mxu0 %v352_v17  ;;  %679 = vmatpush.xpose.msra.mxu1 %v352_v17 }
  0xb0   : > { %683 = vmatpush.xpose.msra.mxu2 %v351_v18  ;;  %684 = vmatpush.xpose.msra.mxu3 %v351_v18 }
  0xb1   : > { %370 = vmatpush.xpose.msra.mxu0 %v351_v18  ;;  %682 = vmatpush.xpose.msra.mxu1 %v351_v18 }
  0xb4   : > { %686 = vmatpush.xpose.msra.mxu2 %v350_v19  ;;  %687 = vmatpush.xpose.msra.mxu3 %v350_v19 }
  0xb5   : > { %371 = vmatpush.xpose.msra.mxu0 %v350_v19  ;;  %685 = vmatpush.xpose.msra.mxu1 %v350_v19 }
  0xb8   : > { %689 = vmatpush.xpose.msra.mxu2 %v349_v20  ;;  %690 = vmatpush.xpose.msra.mxu3 %v349_v20 }
  0xb9   : > { %372 = vmatpush.xpose.msra.mxu0 %v349_v20  ;;  %688 = vmatpush.xpose.msra.mxu1 %v349_v20 }
  0xbc   : > { %692 = vmatpush.xpose.msra.mxu2 %v348_v21  ;;  %693 = vmatpush.xpose.msra.mxu3 %v348_v21 }
  0xbd   : > { %373 = vmatpush.xpose.msra.mxu0 %v348_v21  ;;  %691 = vmatpush.xpose.msra.mxu1 %v348_v21 }
  0xc0   : > { %695 = vmatpush.xpose.msra.mxu2 %v347_v22  ;;  %696 = vmatpush.xpose.msra.mxu3 %v347_v22 }
  0xc1   : > { %374 = vmatpush.xpose.msra.mxu0 %v347_v22  ;;  %694 = vmatpush.xpose.msra.mxu1 %v347_v22 }
  0xc4   : > { %698 = vmatpush.xpose.msra.mxu2 %v346_v23  ;;  %699 = vmatpush.xpose.msra.mxu3 %v346_v23 }
  0xc5   : > { %375 = vmatpush.xpose.msra.mxu0 %v346_v23  ;;  %697 = vmatpush.xpose.msra.mxu1 %v346_v23 }
  0xc8   : > { %701 = vmatpush.xpose.msra.mxu2 %v345_v24  ;;  %702 = vmatpush.xpose.msra.mxu3 %v345_v24 }
  0xc9   : > { %376 = vmatpush.xpose.msra.mxu0 %v345_v24  ;;  %700 = vmatpush.xpose.msra.mxu1 %v345_v24 }
  0xcb   : > { %389 = vmatmul.f32.vlgmr.msra.gmra.mxu2 %v341_v25  ;;  %395 = vmatmul.f32.vlgmr.msra.gmra.mxu3 %v343_v26 }
  0xcc   : > { %377 = vmatmul.f32.vlgmr.msra.gmra.mxu0 %v337_v27  ;;  %383 = vmatmul.f32.vlgmr.msra.gmra.mxu1 %v339_v28 }
  0xd3   : > { %392 = vmatmul.f32.gmra.mxu2 %v342_v29  ;;  %398 = vmatmul.f32.gmra.mxu3 %v344_v30 }
  0xd4   : > { %380 = vmatmul.f32.gmra.mxu0 %v338_v31  ;;  %386 = vmatmul.f32.gmra.mxu1 %v340_v32 }
 0x149   : > { %v378_v35 = vpop.f32.mrf.mxu0  ;;  %v384_v36 = vpop.f32.mrf.mxu1 }
 0x14a   : > { %v402_v37 = vadd.f32 %v378_v35, %v329_v33  ;;  %v404_v38 = vadd.f32 %v384_v36, %v331_v34 }
 0x14c   : > { %410 = vst [vmem:[#allocation2 + $0x30] sm:$0xff] %v402_v37 }
 0x14d   : > { %412 = vst [vmem:[#allocation2 + $0x18] sm:$0xff] %v404_v38 }
 0x14e   : > { %v390_v41 = vpop.f32.mrf.mxu2  ;;  %v396_v42 = vpop.f32.mrf.mxu3 }
 0x14f   : > { %v406_v43 = vadd.f32 %v390_v41, %v333_v39  ;;  %v408_v44 = vadd.f32 %v396_v42, %v335_v40 }
 0x151   : > { %414 = vst [vmem:[#allocation2 + $0x8] sm:$0xff] %v406_v43  ;;  %v381_v47 = vpop.f32.mrf.mxu0  ;;  %v387_v48 = vpop.f32.mrf.mxu1 }
 0x152   : > { %416 = vst [vmem:[#allocation2 + $0x28] sm:$0xff] %v408_v44  ;;  %v403_v49 = vadd.f32 %v381_v47, %v330_v45  ;;  %v405_v50 = vadd.f32 %v387_v48, %v332_v46 }
 0x154   : > { %411 = vst [vmem:[#allocation2] sm:$0xff] %v403_v49 }
 0x155   : > { %413 = vst [vmem:[#allocation2 + $0x10] sm:$0xff] %v405_v50 }
 0x156   : > { %v393_v53 = vpop.f32.mrf.mxu2  ;;  %v399_v54 = vpop.f32.mrf.mxu3  ;;  %421 = sbr.rel (%p645_p0) target bundleno = 362 (0x16a), region = 56 }
 0x157   : > { %v407_v55 = vadd.f32 %v393_v53, %v334_v51  ;;  %v409_v56 = vadd.f32 %v399_v54, %v336_v52 }
 0x159   : > { %415 = vst [vmem:[#allocation2 + $0x20] sm:$0xff] %v407_v55 }
 0x15a   : > { %417 = vst [vmem:[#allocation2 + $0x38] sm:$0xff] %v409_v56 }
 0x15b   : > { %v422_v57 = vld [vmem:[#allocation2 + $0x30] sm:$0xff]  ;;  %v886_v58 = vld [vmem:[%s1477_s7] ss:$0 sm:$0xff]  ;;  %v443_v61 = vld [vmem:[#allocation3 + $0x18] sm:$0xff] }
 0x15c   : > { %v442_v59 = vld [vmem:[#allocation3] sm:$0xff]  ;;  %v434_v62 = vadd.f32 %v886_v58, %v422_v57  ;;  %v424_v0 = vld [vmem:[#allocation2 + $0x18] sm:$0xff]  ;;  %v444_v1 = vld [vmem:[#allocation3 + $0x10] sm:$0xff] }
 0x15d   : > { %v423_v60 = vld [vmem:[#allocation2] sm:$0xff]  ;;  %v425_v2 = vld [vmem:[#allocation2 + $0x10] sm:$0xff]  ;;  %v436_v3 = vadd.f32 %v886_v58, %v424_v0  ;;  %v426_v6 = vld [vmem:[#allocation2 + $0x8] sm:$0xff] }
 0x15e   : > { %v435_v63 = vadd.f32 %v886_v58, %v423_v60  ;;  %v437_v4 = vadd.f32 %v886_v58, %v425_v2  ;;  %v445_v5 = vld [vmem:[#allocation3 + $0x20] sm:$0xff]  ;;  %v446_v7 = vld [vmem:[#allocation3 + $0x28] sm:$0xff]  ;;  %v450_v8 = vadd.f32 %v442_v59, %v434_v62  ;;  %v438_v10 = vadd.f32 %v886_v58, %v426_v6  ;;  %v448_v18 = vld [vmem:[#allocation3 + $0x30] sm:$0xff] }
 0x15f   : > { %v447_v12 = vld [vmem:[#allocation3 + $0x8] sm:$0xff]  ;;  %v452_v14 = vadd.f32 %v444_v1, %v436_v3  ;;  %v449_v20 = vld [vmem:[#allocation3 + $0x38] sm:$0xff] }
 0x160   : > { %v451_v9 = vadd.f32 %v443_v61, %v435_v63  ;;  %v427_v11 = vld [vmem:[#allocation2 + $0x20] sm:$0xff]  ;;  %v428_v13 = vld [vmem:[#allocation2 + $0x28] sm:$0xff]  ;;  %v453_v15 = vadd.f32 %v445_v5, %v437_v4  ;;  %v458_v21 = vmax.f32 %v450_v8, 0.0  ;;  %v454_v23 = vadd.f32 %v446_v7, %v438_v10 }
 0x161   : > { %v439_v16 = vadd.f32 %v886_v58, %v427_v11  ;;  %v440_v17 = vadd.f32 %v886_v58, %v428_v13  ;;  %v429_v19 = vld [vmem:[#allocation2 + $0x38] sm:$0xff]  ;;  %v460_v25 = vmax.f32 %v452_v14, 0.0 }
 0x162   : > { %v459_v22 = vmax.f32 %v451_v9, 0.0  ;;  %v441_v24 = vadd.f32 %v886_v58, %v429_v19  ;;  %v461_v26 = vmax.f32 %v453_v15, 0.0  ;;  %466 = vst [vmem:[%s1486_s8] sm:$0xff] %v458_v21  ;;  %v462_v29 = vmax.f32 %v454_v23, 0.0 }
 0x163   : > { %v455_v27 = vadd.f32 %v447_v12, %v439_v16  ;;  %v456_v28 = vadd.f32 %v448_v18, %v440_v17  ;;  %468 = vst [vmem:[%s1486_s8 + $0x10] sm:$0xff] %v460_v25 }
 0x164   : > { %v457_v30 = vadd.f32 %v449_v20, %v441_v24  ;;  %467 = vst [vmem:[%s1486_s8 + $0x8] sm:$0xff] %v459_v22 }
 0x165   : > { %v463_v31 = vmax.f32 %v455_v27, 0.0  ;;  %v464_v32 = vmax.f32 %v456_v28, 0.0  ;;  %469 = vst [vmem:[%s1486_s8 + $0x18] sm:$0xff] %v461_v26 }
 0x166   : > { %v465_v33 = vmax.f32 %v457_v30, 0.0  ;;  %470 = vst [vmem:[%s1486_s8 + $0x20] sm:$0xff] %v462_v29 }
 0x167   : > { %471 = vst [vmem:[%s1486_s8 + $0x28] sm:$0xff] %v463_v31 }
 0x168   : > { %472 = vst [vmem:[%s1486_s8 + $0x30] sm:$0xff] %v464_v32 }
 0x169   : > { %473 = vst [vmem:[%s1486_s8 + $0x38] sm:$0xff] %v465_v33 }
 0x16a PF: > { %s1680_s25 = sld [smem:[#allocation22_spill]]  ;;  %s489_s2 = sshll.u32 %s1486_s8, 4  ;;  %s490_s2 = int_to_ptr.vmem [resolvable:$true] %s489_s2 }
 0x16b   : > { %s1681_s26 = sld [smem:[#allocation21_spill]]  ;;  %s475_s9 = scalar_lea.sflag [#allocation6], %s291_s18 }
 0x16c   : > { %s1683_s12 = sld [smem:[#allocation33_spill]] }
 0x170   : > { %s654_s6 = sshll.u32 %s1680_s25, 4 }
 0x171   : > { %s486_s27 = sadd.s32 %s1681_s26, %s654_s6 }
 0x172   : > { %s649_s10 = sshll.u32 %s486_s27, 3  ;;  %s1684_s7 = smov %s1683_s12 }
 0x173   : > { %s488_s15 = scalar_lea.hbm %s1683_s12, %s649_s10  ;;  %s997_s8 = scalar_lea.hbm %s1684_s7, 256 }
 0x174   : > { %s491_s5 = sshll.u32 %s488_s15, 4  ;;  %s492_s5 = int_to_ptr.hbm [resolvable:$true] %s491_s5 }
 0x175   : > { %s991_s3 = sshra.s32 %s492_s5, 4  ;;  %s992_s3 = int_to_ptr.hbm [resolvable:$true] %s991_s3 }
 0x176   : > { %s993_s21 = scalar_lea.hbm %s992_s3, 64  ;;  %p998_p4 = scmp.lt.s32.totalorder %s992_s3, %s1684_s7 }
 0x177   : > { %p994_p2 = scmp.ne.s32.totalorder %s992_s3, %s993_s21  ;;  %p999_p7 = scmp.lt.s32.totalorder %s997_s8, %s993_s21 }
 0x179   : > { %p995_p3 = pnand %p994_p2, %p1441_p6  ;;  %p1000_p5 = por %p999_p7, %p998_p4 }
 0x17b   : > { %p996_p13 = pneg %p995_p3 }
 0x17d   : > { %p1001_p9 = pnand %p1000_p5, %p996_p13 }
 0x17f   : > { %1004 = shalt.err (!%p1001_p9)
}
 0x180   : > { %s1177_s18 = smov 128   ;;  %s1178_s4 = smov 256  }
 0x181   : > { %s1179_s27 = smov 8  }
 0x182   : > { %709 = dma.vmem_to_hbm [thread:$0]  (%p1441_p6), %s490_s2, 1024, %s492_s5, %s475_s9, %s1177_s18, %s1178_s4, %s1179_s27  }
 0x183 PF: > { %s1685_s10 = sld [smem:[#allocation15_spill]]  ;;  %p726_p8 = scmp.ge.s32.totalorder %s1171_s30, 2 }
 0x185   : > { %p722_p10 = pnand %p726_p8, %p1450_p1 }
 0x187   : > { %p723_p11 = pneg %p722_p10 }
 0x189   : > { %s506_s13 = sand.u32 1, %s1685_s10  }
 0x18a   : > { %s507_s0 = scalar_lea.sflag [#allocation6], %s506_s13 }
 0x18b   : > { %1094 = dma.done.wait (%p723_p11), %s507_s0, 1024  }
 0x18c   : > { %1096 = vsyncadd (%p723_p11), %s507_s0, 4294966272  ;;  %s22_s30 = sadd.s32 1, %s1171_s30   ;;  %s1688_s12 = sld [smem:[#allocation16_spill]] }
 0x18d   : > { %p1556_p12 = scmp.ge.s32.totalorder %s22_s30, 10   ;;  %s1689_s29 = sld [smem:[#allocation27_spill]] }
 0x18e   : > { %s1690_s24 = sld [smem:[#allocation19_spill]]  ;;  %s1696_s13 = smov %s1107_s14 }
 0x18f   : > { %s1691_s2 = sld [smem:[#allocation29_spill]]  ;;  %s1698_s14 = smov %s1385_s1 }
 0x190   : > { %s1692_s5 = sld [smem:[#allocation23_spill]]  ;;  %s1699_s15 = smov %s1115_s16 }
 0x191   : > { %s1693_s26 = sld [smem:[#allocation24_spill]]  ;;  %s1700_s16 = smov %s1119_s17 }
 0x192   : > { %s1694_s27 = sld [smem:[#allocation25_spill]]  ;;  %s1701_s17 = smov %s1422_s23 }
 0x193   : > { %s1695_s9 = sld [smem:[#allocation26_spill]]  ;;  %s1702_s18 = smov %s1127_s19 }
 0x194   : > { %s1697_s11 = sld [smem:[#allocation28_spill]]  ;;  %s1703_s19 = smov %s1131_s20 }
 0x195   : > { %s1704_s20 = smov %s1689_s29  ;;  %s1705_s21 = smov %s1139_s22 }
 0x196   : > { %s1706_s22 = smov %s1690_s24  ;;  %s1707_s23 = smov %s1691_s2 }
 0x197   : > { %s1708_s24 = smov %s1692_s5  ;;  %s1709_s25 = smov %s1163_s28 }
 0x198   :  { %21 = sbr.rel (!%p1556_p12) target bundleno = 20 (0x14), region = 113 }
 0x199   : > { %s1710_s28 = smov %s1695_s9 }
 0x19a   : > { %s1711_s29 = smov %s1697_s11 }
 0x19d   :  { %513 = vsyncpa [#allocation5], 1 }
 0x19e   :  { %515 = vsyncpa [#allocation5 + $0x1], 1 }
 0x19f   :  { %516 = vsyncpa [#allocation8], 1 }
 0x1a0   :  { %518 = vsyncpa [#allocation8 + $0x1], 1 }
 0x1a1   :  { %519 = vsyncpa [#allocation6], 1 }
 0x1a2   :  { %521 = vsyncpa [#allocation6 + $0x1], 1 }

</bundles_post_ra>
